<compile_context>
chip_gen: v7x
topology: tpu7x:2x2x1
jax: 0.10.0
libtpu: 0.0.40
codegen_flags: <defaults>
</compile_context>

<pallas_src>
import jax
import jax.numpy as jnp
from jax.experimental import pallas as pl
from jax.experimental.pallas import tpu as pltpu

N = 8        # batch rows of x1
K = 15       # contraction dim (rows of x2 / para2)
M = 2        # cols of x2 / rows of para


def motif_grade_kernel(x1_ref, x2_ref, p2_ref, p1_ref, o_ref):
    """x1: (N,K) VMEM, x2: (K,M) VMEM, p2=para2: (K,1) VMEM, p1=para: (M,1) SMEM."""
    # para scalars straight from SMEM (no vector broadcast, no sublane reduce)
    pa = p1_ref[0, 0]
    pb = p1_ref[1, 0]
    # w = (x2 * para2) @ para as a (K, 1) column:
    #   VPU lane-slice muls with scalar multipliers + elementwise mul by para2
    w_col = p2_ref[...] * (x2_ref[:, 0:1] * pa + x2_ref[:, 1:2] * pb)    # (K, 1)
    # single-vreg relayout column -> lane-dense row on the XLU
    w_row = jnp.transpose(w_col)                                          # (1, K)
    # x4 = x1 @ w : VPU broadcast-mul + lane reduce over K (no MXU needed)
    x4 = jnp.sum(x1_ref[...] * w_row, axis=1, keepdims=True)              # (N, 1)
    # out = tanh(x4) : EUP
    o_ref[...] = jnp.tanh(x4)


def motif_grade(x1, x2, para2, para):
    """x1: (N,K) f32, x2: (K,M) f32, para2: (K,1) f32, para: (M,1) f32 -> (N,1) f32.

    All operands are passed in their natural layouts (zero wrapper-side XLA
    ops); para goes to SMEM, everything else to VMEM with full-array blocks.
    """
    n, _ = x1.shape
    return pl.pallas_call(
        motif_grade_kernel,
        out_shape=jax.ShapeDtypeStruct((n, 1), jnp.float32),
        in_specs=[
            pl.BlockSpec(memory_space=pltpu.MemorySpace.VMEM),   # x1    (N, K)
            pl.BlockSpec(memory_space=pltpu.MemorySpace.VMEM),   # x2    (K, M)
            pl.BlockSpec(memory_space=pltpu.MemorySpace.VMEM),   # para2 (K, 1)
            pl.BlockSpec(memory_space=pltpu.MemorySpace.SMEM),   # para  (M, 1) scalars
        ],
        out_specs=pl.BlockSpec(memory_space=pltpu.MemorySpace.VMEM),
        # ~300 flops, N tanh calls, ~700 B of input+output traffic: advise XLA
        # that this custom call is cheap so it schedules/overlaps around it.
        cost_estimate=pl.CostEstimate(flops=300, transcendentals=N, bytes_accessed=704),
    )(x1, x2, para2, para)


def motif_grade_ref(x1, x2, para2, para):
    tt = x2 * para2
    x3 = x1 @ tt
    x4 = x3 @ para
    return jnp.tanh(x4)


if __name__ == "__main__":
    key = jax.random.PRNGKey(0)
    k1, k2, k3, k4 = jax.random.split(key, 4)

    # deterministic "parameters" (module __init__ used np.random.random -> [0, 1))
    para = jax.random.uniform(k3, (M, 1), dtype=jnp.float32)
    para2 = jax.random.uniform(k4, (K, 1), dtype=jnp.float32)

    # inputs consistent with the forward pass
    x1 = jax.random.normal(k1, (N, K), dtype=jnp.float32)
    x2 = jax.random.normal(k2, (K, M), dtype=jnp.float32)

    out = motif_grade(x1, x2, para2, para)
    out = jax.block_until_ready(out)

    ref = motif_grade_ref(x1, x2, para2, para)
    assert out.shape == (N, 1), out.shape
    assert jnp.allclose(out, ref, atol=1e-5, rtol=1e-5), (out, ref)

    print("KERNEL_OK")
</pallas_src>

<mosaic_0001>
module attributes {stable_mosaic.version = 11 : i64} {
  func.func @motif_grade_kernel(%arg0: memref<8x15xf32, #tpu.memory_space<vmem>>, %arg1: memref<15x2xf32, #tpu.memory_space<vmem>>, %arg2: memref<15x1xf32, #tpu.memory_space<vmem>>, %arg3: memref<2x1xf32, #tpu.memory_space<smem>>, %arg4: memref<8x1xf32, #tpu.memory_space<vmem>>) attributes {dimension_semantics = [], scalar_prefetch = 0 : i64, scratch_operands = 0 : i64, tpu.core_type = #tpu.core_type<tc>} {
    %c0 = arith.constant 0 : index
    %c0_0 = arith.constant 0 : index
    %0 = memref.load %arg3[%c0, %c0_0] : memref<2x1xf32, #tpu.memory_space<smem>>
    %c1 = arith.constant 1 : index
    %c0_1 = arith.constant 0 : index
    %1 = memref.load %arg3[%c1, %c0_1] : memref<2x1xf32, #tpu.memory_space<smem>>
    %c0_2 = arith.constant 0 : index
    %c0_3 = arith.constant 0 : index
    %2 = vector.load %arg2[%c0_2, %c0_3] : memref<15x1xf32, #tpu.memory_space<vmem>>, vector<15x1xf32>
    %c0_4 = arith.constant 0 : index
    %c0_5 = arith.constant 0 : index
    %3 = vector.load %arg1[%c0_4, %c0_5] : memref<15x2xf32, #tpu.memory_space<vmem>>, vector<15x1xf32>
    %4 = vector.broadcast %0 : f32 to vector<15x1xf32>
    %5 = arith.mulf %3, %4 : vector<15x1xf32>
    %c0_6 = arith.constant 0 : index
    %c1_7 = arith.constant 1 : index
    %6 = vector.load %arg1[%c0_6, %c1_7] : memref<15x2xf32, #tpu.memory_space<vmem>>, vector<15x1xf32>
    %7 = vector.broadcast %1 : f32 to vector<15x1xf32>
    %8 = arith.mulf %6, %7 : vector<15x1xf32>
    %9 = arith.addf %5, %8 : vector<15x1xf32>
    %10 = arith.mulf %2, %9 : vector<15x1xf32>
    %11 = tpu.transpose %10, [1, 0] : vector<15x1xf32> -> vector<1x15xf32>
    %c0_8 = arith.constant 0 : index
    %c0_9 = arith.constant 0 : index
    %12 = vector.load %arg0[%c0_8, %c0_9] : memref<8x15xf32, #tpu.memory_space<vmem>>, vector<8x15xf32>
    %13 = vector.broadcast %11 : vector<1x15xf32> to vector<8x15xf32>
    %14 = arith.mulf %12, %13 : vector<8x15xf32>
    %cst = arith.constant dense<0.000000e+00> : vector<8xf32>
    %15 = vector.multi_reduction <add>, %14, %cst [1] : vector<8x15xf32> to vector<8xf32>
    %16 = vector.shape_cast %15 : vector<8xf32> to vector<8x1xf32>
    %17 = math.tanh %16 : vector<8x1xf32>
    %c0_10 = arith.constant 0 : index
    %c0_11 = arith.constant 0 : index
    %18 = vector.load %arg4[%c0_10, %c0_11] : memref<8x1xf32, #tpu.memory_space<vmem>>, vector<8x1xf32>
    tpu.vector_store %arg4[%c0_10, %c0_11], %17 {strides = array<i32>} : memref<8x1xf32, #tpu.memory_space<vmem>>, vector<8x1xf32>,
    return
  }
}

</mosaic_0001>

<bundles_post_ra>
// kernel: tpu_custom_call.1
= control target key start
LH: loop header
LB: loop body
LE: loop exit
PB: predicated region body
PF: predicated region fallthrough
CT: control target
= control target key end

     0   :  { %9 = vsyncpa [#allocation3], 0  ;;  %s172_s0 = inlined_call_operand.vmem [shape: f32[8,15], index: 0, kind: input, shape index: {}]   ;;  %s173_s1 = inlined_call_operand.vmem [shape: f32[15,2], index: 1, kind: input, shape index: {}]   ;;  %s174_s2 = inlined_call_operand.vmem [shape: f32[15,1], index: 2, kind: input, shape index: {}]   ;;  %s175_s3 = inlined_call_operand.vmem [shape: f32[2,1], index: 3, kind: input, shape index: {}]   ;;  %s176_s4 = inlined_call_operand.vmem [shape: f32[8,1], index: 4, kind: output, shape index: {}]  }
   0x1   :  { %s22_s17 = sshll.u32 %s175_s3, 4  ;;  %s23_s17 = int_to_ptr.vmem [resolvable:$true] %s22_s17 }
   0x2   :  { %s110_s18 = scalar_lea.vmem %s23_s17, 32  ;;  %p115_p1 = scmp.lt.s32.totalorder %s23_s17, %s23_s17 }
   0x3   :  { %p111_p0 = scmp.ne.s32.totalorder %s23_s17, %s110_s18  ;;  %p116_p2 = scmp.lt.s32.totalorder %s110_s18, %s110_s18 }
   0x5   :  { %p117_p3 = por %p116_p2, %p115_p1 }
   0x7   :  { %p118_p4 = pnand %p117_p3, %p111_p0 }
   0x9   :  { %121 = shalt.err (!%p118_p4)
}
   0xa   :  { %s124_s19 = smov [#allocation2]  }
   0xb   :  { %25 = dma.vmem_to_smem %s23_s17, 32, %s124_s19, [#allocation3]  }
   0xc   :  { %122 = dma.done.wait [#allocation3], 32  }
   0xd   :  { %123 = vsyncadd [#allocation3], 4294967264 }
   0xe   :  { %29 = sfence }
   0xf   :  { %s104_s20 = sld [smem:[#allocation2 + $0x80]]  ;;  %v34_v0 = vld [vmem:[%s173_s1] sm:$0xff]  ;;  %v35_v1 = vld [vmem:[%s173_s1 + $0x8] sm:$0x7f]  ;;  %s125_s24 = smov 127   ;;  %v87_v16 = vlaneseq  ;;  %vm92_vm0 = vcmask 121856  }
  0x10   :  { %s30_s25 = sld [smem:[#allocation2]]  ;;  %v32_v8 = vld [vmem:[%s174_s2] sm:$0xff]  ;;  %v33_v13 = vld [vmem:[%s174_s2 + $0x8] sm:$0x7f]  ;;  %vm97_vm1 = vcmask 7168  }
  0x11   :  { %v88_v17 = vshrl.u32 %v87_v16, 7  ;;  %v86_v20 = vld [vmem:[%s172_s0] sm:$0xff] }
  0x13   :  { %v89_v18 = vsub.s32 0, %v88_v17 }
  0x15   :  { %v39_v2 = vstv %s104_s20 }
  0x16   :  { %v40_v3 = vmul.f32 %v39_v2, %v34_v0  ;;  %v41_v4 = vmul.f32 %v39_v2, %v35_v1  ;;  %v36_v5 = vstv %s30_s25 }
  0x17   :  { %v37_v6 = vmul.f32 %v36_v5, %v34_v0  ;;  %v38_v10 = vmul.f32 %v36_v5, %v35_v1 }
  0x18   :  { %44 = vrot.lane.b32.xlu0 %v40_v3, %s125_s24 }
  0x1c   :  { %46 = vrot.lane.b32.xlu0 %v41_v4, %s125_s24 }
  0x8a   :  { %v45_v7 = vpop.permute.xlu0 %44 }
  0x8b   :  { %v50_v9 = vadd.f32 %v45_v7, %v37_v6 }
  0x8d   :  { %v52_v11 = vmul.f32 %v50_v9, %v32_v8 }
  0x8e   :  { %v47_v12 = vpop.permute.xlu0 %46 }
  0x8f   :  { %v51_v14 = vadd.f32 %v47_v12, %v38_v10  ;;  %54 = vxpose.xlu1.b32.start [1/2] (short) (narrow) %v52_v11, 8 }
  0x91   :  { %v53_v15 = vmul.f32 %v51_v14, %v33_v13 }
  0x93   :  { %55 = vxpose.xlu1.b32.end [2/2] (short) (narrow) %v53_v15, 8 }
 0x10f   :  { %v70_v19 = vpop.trf.xlu1 }
 0x110   :  { %v90_v21 = vrot.slane %v70_v19, %v89_v18 }
 0x112   :  { %v91_v22 = vmul.f32 %v90_v21, %v86_v20 }
 0x114   :  { %v93_v23 = vsel %vm92_vm0, %v91_v22, 0.0 }
 0x115   :  { %94 = vadd.xlane.f32.xlu0 %v93_v23 }
 0x1a2   :  { %v95_v24 = vpop.xlane.xlu0 %94 }
 0x1a3   :  { %108 = vtanh.f32 %v95_v24 }
 0x1ad   :  { %v109_v25 = vpop.eup %108 }
 0x1ae   :  { %98 = vst.msk [vmem:[%s176_s4] sm:$0xff] %vm97_vm1, %v109_v25 }
 0x1af   :  { %103 = vsyncpa [#allocation3], 1 }

</bundles_post_ra>
